<compile_context>
chip_gen: v7x
topology: tpu7x:2x2x1
jax: 0.10.0
libtpu: 0.0.40
codegen_flags: <defaults>
</compile_context>

<pallas_src>
import jax
import jax.numpy as jnp
from jax.experimental import pallas as pl
from jax.experimental.pallas import tpu as pltpu


# ---------------------------------------------------------------------------
# small helpers
# ---------------------------------------------------------------------------
def _softplus(v):
    # matches F.softplus(beta=1), numerically stable
    return jnp.logaddexp(v, 0.0)


def _reparam(mu, logvar, eps):
    # std = exp(logvar).sqrt() == exp(logvar / 2)
    return mu + eps * jnp.exp(logvar * 0.5)


# ---------------------------------------------------------------------------
# kernel 1: x-independent elementwise prep over (in_dim, out_dim):
#   lambd (f32 module output) and mgp (bf16, already in GEMM operand dtype).
# ---------------------------------------------------------------------------
def prep_kernel(lm_ref, llv_ref, el_ref, wm_ref, wlv_ref, ew_ref,
                lambd_ref, mgp_ref):
    lambd_ref[...] = jnp.exp(_reparam(lm_ref[...], llv_ref[...], el_ref[...]))
    w = jnp.exp(_reparam(wm_ref[...], wlv_ref[...], ew_ref[...]))
    mgp_ref[...] = _softplus(w).astype(jnp.bfloat16)


def _prep_lambd_mgp(params, eps):
    in_dim, out_dim = params["lambd_m"].shape
    # 256x512 f32 blocks x 8 operands x 2 buffers ~= 8 MiB -> fits v5e's 16 MiB
    # default scoped VMEM.  Full-dim blocks when the dims are small.
    rt = in_dim if in_dim <= 256 else 256   # 256 is a multiple of 8
    ct = out_dim if out_dim <= 512 else 512  # 512 is a multiple of 128
    grid = (pl.cdiv(in_dim, rt), pl.cdiv(out_dim, ct))
    spec = pl.BlockSpec((rt, ct), lambda i, j: (i, j))

    lambd, mgp = pl.pallas_call(
        prep_kernel,
        out_shape=(jax.ShapeDtypeStruct((in_dim, out_dim), jnp.float32),
                   jax.ShapeDtypeStruct((in_dim, out_dim), jnp.bfloat16)),
        grid_spec=pltpu.PrefetchScalarGridSpec(
            num_scalar_prefetch=0,
            grid=grid,
            in_specs=[spec] * 6,
            out_specs=(spec, spec),
        ),
        compiler_params=pltpu.CompilerParams(
            dimension_semantics=("parallel", "parallel")),
    )(params["lambd_m"], params["lambd_logvar"], eps["lambd"],
      params["w_m"], params["w_logvar"], eps["w"])
    return lambd, mgp


# ---------------------------------------------------------------------------
# kernel 2: tiny x prep — softplus(x) and x, both cast to bf16 for the MXU.
# Hoists the EUP softplus out of the GEMM (otherwise recomputed per N tile).
# ---------------------------------------------------------------------------
def x_prep_kernel(x_ref, spx_ref, xb_ref):
    xv = x_ref[...]
    spx_ref[...] = _softplus(xv).astype(jnp.bfloat16)
    xb_ref[...] = xv.astype(jnp.bfloat16)


def _prep_x(x):
    B, in_dim = x.shape
    tm = B if B <= 1024 else 1024   # 1024 is a multiple of 8
    grid = (pl.cdiv(B, tm),)
    spec = pl.BlockSpec((tm, in_dim), lambda i: (i, 0))
    spx, xb = pl.pallas_call(
        x_prep_kernel,
        out_shape=(jax.ShapeDtypeStruct((B, in_dim), jnp.bfloat16),
                   jax.ShapeDtypeStruct((B, in_dim), jnp.bfloat16)),
        grid_spec=pltpu.PrefetchScalarGridSpec(
            num_scalar_prefetch=0,
            grid=grid,
            in_specs=[spec],
            out_specs=(spec, spec),
        ),
        compiler_params=pltpu.CompilerParams(
            dimension_semantics=("parallel",)),
    )(x.astype(jnp.float32))
    return spx, xb


# ---------------------------------------------------------------------------
# kernel 3: fused single-K-block GEMM(s).
#   grid = (N_tiles, B_tiles), B innermost -> weight tiles stay VMEM-resident
#   across the batch sweep (fetched once per forward per core).
# ---------------------------------------------------------------------------
def gemm_kernel_zinb(spx_ref, xb_ref, mgp_ref, dow_ref, dob_ref,
                     mean_ref, drop_ref):
    mean_ref[...] = jnp.dot(spx_ref[...], mgp_ref[...],
                            preferred_element_type=jnp.float32)
    drop_ref[...] = (jnp.dot(xb_ref[...], dow_ref[...],
                             preferred_element_type=jnp.float32)
                     + dob_ref[...])


def gemm_kernel_nb(spx_ref, mgp_ref, mean_ref):
    mean_ref[...] = jnp.dot(spx_ref[...], mgp_ref[...],
                            preferred_element_type=jnp.float32)


def _fused_gemm(spx, xb, mgp, do_wT_bf16, do_b, *, with_dropout):
    B, in_dim = spx.shape
    out_dim = mgp.shape[1]
    f32 = jnp.float32

    # Full-dim blocks for small dims (legal even if not (8,128)-aligned),
    # otherwise aligned caps; ragged last tiles are masked on store.  K is
    # always the full in_dim (single block, no reduction grid axis).
    tm = B if B <= 512 else 512          # 512 multiple of 8 (and of 256)
    tn = out_dim if out_dim <= 512 else 512  # 512 multiple of 128

    grid = (pl.cdiv(out_dim, tn), pl.cdiv(B, tm))  # (N outer, B inner)

    x_spec = pl.BlockSpec((tm, in_dim), lambda j, i: (i, 0))
    w_spec = pl.BlockSpec((in_dim, tn), lambda j, i: (0, j))
    b_spec = pl.BlockSpec((1, tn), lambda j, i: (0, j))
    o_spec = pl.BlockSpec((tm, tn), lambda j, i: (i, j))

    # N axis parallel (megacore split on v7x halves per-TC weight traffic);
    # inner B axis left "arbitrary" to preserve weight residency.
    cparams = pltpu.CompilerParams(
        dimension_semantics=("parallel", "arbitrary"))

    if with_dropout:
        mean, drop = pl.pallas_call(
            gemm_kernel_zinb,
            out_shape=(jax.ShapeDtypeStruct((B, out_dim), f32),
                       jax.ShapeDtypeStruct((B, out_dim), f32)),
            grid_spec=pltpu.PrefetchScalarGridSpec(
                num_scalar_prefetch=0,
                grid=grid,
                in_specs=[x_spec, x_spec, w_spec, w_spec, b_spec],
                out_specs=(o_spec, o_spec),
            ),
            compiler_params=cparams,
        )(spx, xb, mgp, do_wT_bf16, do_b)
        return mean, drop

    mean = pl.pallas_call(
        gemm_kernel_nb,
        out_shape=jax.ShapeDtypeStruct((B, out_dim), f32),
        grid_spec=pltpu.PrefetchScalarGridSpec(
            num_scalar_prefetch=0,
            grid=grid,
            in_specs=[x_spec, w_spec],
            out_specs=o_spec,
        ),
        compiler_params=cparams,
    )(spx, mgp)
    return mean, None


# ---------------------------------------------------------------------------
# public forward
# ---------------------------------------------------------------------------
def decoder_forward(x, params, eps, *, recon_type="zinb"):
    """Fused Decoder forward pass (Pallas TPU)."""
    lambd, mgp = _prep_lambd_mgp(params, eps)

    # c is 3 scalar flops; keeping it out of the kernels removes (1,1) VMEM
    # operands / masked stores from the epilogue.
    c = jnp.exp(_reparam(params["c_m"], params["c_logvar"], eps["c"]))

    spx, xb = _prep_x(x)

    with_dropout = recon_type == "zinb"
    if with_dropout:
        dow_bf16 = params["do_wT"].astype(jnp.bfloat16)
        do_b = params["do_b"].astype(jnp.float32).reshape(1, -1)
        mean, dropout = _fused_gemm(spx, xb, mgp, dow_bf16, do_b,
                                    with_dropout=True)
    else:
        mean, dropout = _fused_gemm(spx, None, mgp, None, None,
                                    with_dropout=False)

    outputs = {"mean": mean, "lambd": lambd, "c": c}
    if with_dropout:
        outputs["dropout"] = dropout
    return outputs


# ---------------------------------------------------------------------------
# plain-JAX reference (mirrors the PyTorch module, highest-precision matmuls)
# ---------------------------------------------------------------------------
def _reference_forward(x, params, eps, recon_type="zinb"):
    hi = jax.lax.Precision.HIGHEST
    lambd = jnp.exp(_reparam(params["lambd_m"], params["lambd_logvar"],
                             eps["lambd"]))
    c = jnp.exp(_reparam(params["c_m"], params["c_logvar"], eps["c"]))
    w = jnp.exp(_reparam(params["w_m"], params["w_logvar"], eps["w"]))
    mgp = jax.nn.softplus(w)
    out = {"mean": jnp.dot(jax.nn.softplus(x), mgp, precision=hi),
           "lambd": lambd, "c": c}
    if recon_type == "zinb":
        out["dropout"] = jnp.dot(x, params["do_wT"], precision=hi) + params["do_b"]
    return out


def _check(name, got, ref, rtol, atol):
    assert got.shape == ref.shape, (name, got.shape, ref.shape)
    err = float(jnp.max(jnp.abs(got - ref)))
    tol = float(atol + rtol * jnp.max(jnp.abs(ref)))
    assert err <= tol, (name, err, tol)


if __name__ == "__main__":
    # Small shapes consistent with the module: x: (batch, in_dim)
    B, in_dim, out_dim = 8, 16, 32
    key = jax.random.PRNGKey(0)
    k_x, k_lm, k_cm, k_wm, k_dow, k_dob, k_el, k_ec, k_ew = jax.random.split(key, 9)

    x = jax.random.normal(k_x, (B, in_dim), dtype=jnp.float32)

    params = {
        "lambd_m": jax.random.normal(k_lm, (in_dim, out_dim), dtype=jnp.float32),
        "lambd_logvar": jnp.zeros((in_dim, out_dim), jnp.float32),
        "c_m": jax.random.normal(k_cm, (1,), dtype=jnp.float32),
        "c_logvar": jnp.zeros((1,), jnp.float32),
        "w_m": jax.random.normal(k_wm, (in_dim, out_dim), dtype=jnp.float32),
        "w_logvar": jnp.zeros((in_dim, out_dim), jnp.float32),
        # nn.Linear(in_dim, out_dim): weight (out_dim, in_dim) — stored transposed.
        "do_wT": jax.random.normal(k_dow, (in_dim, out_dim), dtype=jnp.float32) * 0.1,
        "do_b": jax.random.normal(k_dob, (out_dim,), dtype=jnp.float32) * 0.1,
    }

    # Reparameterization noise (torch.randn_like equivalents), supplied so the
    # random draw is deterministic and shared with the reference.
    eps = {
        "lambd": jax.random.normal(k_el, (in_dim, out_dim), dtype=jnp.float32),
        "c": jax.random.normal(k_ec, (1,), dtype=jnp.float32),
        "w": jax.random.normal(k_ew, (in_dim, out_dim), dtype=jnp.float32),
    }

    fwd = jax.jit(decoder_forward, static_argnames=("recon_type",))

    # zinb branch (mean + lambd + c + dropout)
    outputs = fwd(x, params, eps, recon_type="zinb")
    jax.block_until_ready(outputs)
    ref = _reference_forward(x, params, eps, recon_type="zinb")
    # lambd / c computed in f32 -> tight tolerance; mean / dropout use bf16 MXU
    # operands (f32 accumulation) -> relaxed tolerance vs the f32 reference.
    _check("lambd", outputs["lambd"], ref["lambd"], rtol=1e-5, atol=1e-5)
    _check("c", outputs["c"], ref["c"], rtol=1e-5, atol=1e-5)
    _check("mean", outputs["mean"], ref["mean"], rtol=2e-2, atol=2e-2)
    _check("dropout", outputs["dropout"], ref["dropout"], rtol=2e-2, atol=2e-2)

    # nb branch (no dropout GEMM computed at all)
    outputs_nb = fwd(x, params, eps, recon_type="nb")
    jax.block_until_ready(outputs_nb)
    ref_nb = _reference_forward(x, params, eps, recon_type="nb")
    assert "dropout" not in outputs_nb
    _check("lambd", outputs_nb["lambd"], ref_nb["lambd"], rtol=1e-5, atol=1e-5)
    _check("c", outputs_nb["c"], ref_nb["c"], rtol=1e-5, atol=1e-5)
    _check("mean", outputs_nb["mean"], ref_nb["mean"], rtol=2e-2, atol=2e-2)

    print("KERNEL_OK")
</pallas_src>

<mosaic_0001>
module attributes {stable_mosaic.version = 11 : i64} {
  func.func @prep_kernel(%arg0: i32, %arg1: i32, %arg2: memref<16x32xf32, #tpu.memory_space<vmem>>, %arg3: memref<16x32xf32, #tpu.memory_space<vmem>>, %arg4: memref<16x32xf32, #tpu.memory_space<vmem>>, %arg5: memref<16x32xf32, #tpu.memory_space<vmem>>, %arg6: memref<16x32xf32, #tpu.memory_space<vmem>>, %arg7: memref<16x32xf32, #tpu.memory_space<vmem>>, %arg8: memref<16x32xf32, #tpu.memory_space<vmem>>, %arg9: memref<16x32xbf16, #tpu.memory_space<vmem>>) attributes {dimension_semantics = [#tpu.dimension_semantics<parallel>, #tpu.dimension_semantics<parallel>], iteration_bounds = array<i64: 1, 1>, scalar_prefetch = 0 : i64, scratch_operands = 0 : i64, tpu.core_type = #tpu.core_type<tc>, window_params = [{transform_indices = @transform_0, window_bounds = array<i64: 16, 32>}, {transform_indices = @transform_1, window_bounds = array<i64: 16, 32>}, {transform_indices = @transform_2, window_bounds = array<i64: 16, 32>}, {transform_indices = @transform_3, window_bounds = array<i64: 16, 32>}, {transform_indices = @transform_4, window_bounds = array<i64: 16, 32>}, {transform_indices = @transform_5, window_bounds = array<i64: 16, 32>}, {transform_indices = @transform_6, window_bounds = array<i64: 16, 32>}, {transform_indices = @transform_7, window_bounds = array<i64: 16, 32>}]} {
    %c0 = arith.constant 0 : index
    %c0_0 = arith.constant 0 : index
    %0 = vector.load %arg2[%c0, %c0_0] : memref<16x32xf32, #tpu.memory_space<vmem>>, vector<16x32xf32>
    %c0_1 = arith.constant 0 : index
    %c0_2 = arith.constant 0 : index
    %1 = vector.load %arg3[%c0_1, %c0_2] : memref<16x32xf32, #tpu.memory_space<vmem>>, vector<16x32xf32>
    %c0_3 = arith.constant 0 : index
    %c0_4 = arith.constant 0 : index
    %2 = vector.load %arg4[%c0_3, %c0_4] : memref<16x32xf32, #tpu.memory_space<vmem>>, vector<16x32xf32>
    %cst = arith.constant 5.000000e-01 : f32
    %3 = vector.broadcast %cst : f32 to vector<16x32xf32>
    %4 = arith.mulf %1, %3 : vector<16x32xf32>
    %5 = math.exp %4 : vector<16x32xf32>
    %6 = arith.mulf %2, %5 : vector<16x32xf32>
    %7 = arith.addf %0, %6 : vector<16x32xf32>
    %8 = math.exp %7 : vector<16x32xf32>
    %c0_5 = arith.constant 0 : index
    %c0_6 = arith.constant 0 : index
    %9 = vector.load %arg8[%c0_5, %c0_6] : memref<16x32xf32, #tpu.memory_space<vmem>>, vector<16x32xf32>
    tpu.vector_store %arg8[%c0_5, %c0_6], %8 {strides = array<i32>} : memref<16x32xf32, #tpu.memory_space<vmem>>, vector<16x32xf32>,
    %c0_7 = arith.constant 0 : index
    %c0_8 = arith.constant 0 : index
    %10 = vector.load %arg5[%c0_7, %c0_8] : memref<16x32xf32, #tpu.memory_space<vmem>>, vector<16x32xf32>
    %c0_9 = arith.constant 0 : index
    %c0_10 = arith.constant 0 : index
    %11 = vector.load %arg6[%c0_9, %c0_10] : memref<16x32xf32, #tpu.memory_space<vmem>>, vector<16x32xf32>
    %c0_11 = arith.constant 0 : index
    %c0_12 = arith.constant 0 : index
    %12 = vector.load %arg7[%c0_11, %c0_12] : memref<16x32xf32, #tpu.memory_space<vmem>>, vector<16x32xf32>
    %cst_13 = arith.constant 5.000000e-01 : f32
    %13 = vector.broadcast %cst_13 : f32 to vector<16x32xf32>
    %14 = arith.mulf %11, %13 : vector<16x32xf32>
    %15 = math.exp %14 : vector<16x32xf32>
    %16 = arith.mulf %12, %15 : vector<16x32xf32>
    %17 = arith.addf %10, %16 : vector<16x32xf32>
    %18 = math.exp %17 : vector<16x32xf32>
    %cst_14 = arith.constant 0.000000e+00 : f32
    %19 = vector.broadcast %cst_14 : f32 to vector<16x32xf32>
    %20 = arith.maximumf %18, %19 : vector<16x32xf32>
    %21 = vector.broadcast %cst_14 : f32 to vector<16x32xf32>
    %22 = arith.subf %18, %21 : vector<16x32xf32>
    %23 = arith.cmpf one, %22, %22 : vector<16x32xf32>
    %24 = vector.broadcast %cst_14 : f32 to vector<16x32xf32>
    %25 = arith.addf %18, %24 : vector<16x32xf32>
    %26 = math.absf %22 : vector<16x32xf32>
    %cst_15 = arith.constant 0.000000e+00 : f32
    %27 = vector.broadcast %cst_15 : f32 to vector<16x32xf32>
    %28 = arith.subf %27, %26 : vector<16x32xf32>
    %29 = math.exp %28 : vector<16x32xf32>
    %30 = math.log1p %29 : vector<16x32xf32>
    %31 = arith.addf %20, %30 : vector<16x32xf32>
    %32 = arith.select %23, %25, %31 : vector<16x32xi1>, vector<16x32xf32>
    %33 = arith.truncf %32 : vector<16x32xf32> to vector<16x32xbf16>
    %c0_16 = arith.constant 0 : index
    %c0_17 = arith.constant 0 : index
    %34 = vector.load %arg9[%c0_16, %c0_17] : memref<16x32xbf16, #tpu.memory_space<vmem>>, vector<16x32xbf16>
    tpu.vector_store %arg9[%c0_16, %c0_17], %33 {strides = array<i32>} : memref<16x32xbf16, #tpu.memory_space<vmem>>, vector<16x32xbf16>,
    return
  }
  func.func @transform_0(%arg0: i32, %arg1: i32) -> (i32, i32) {
    %c0_i32 = arith.constant 0 : i32
    return %arg0, %arg1 : i32, i32
  }
  func.func @transform_1(%arg0: i32, %arg1: i32) -> (i32, i32) {
    %c0_i32 = arith.constant 0 : i32
    return %arg0, %arg1 : i32, i32
  }
  func.func @transform_2(%arg0: i32, %arg1: i32) -> (i32, i32) {
    %c0_i32 = arith.constant 0 : i32
    return %arg0, %arg1 : i32, i32
  }
  func.func @transform_3(%arg0: i32, %arg1: i32) -> (i32, i32) {
    %c0_i32 = arith.constant 0 : i32
    return %arg0, %arg1 : i32, i32
  }
  func.func @transform_4(%arg0: i32, %arg1: i32) -> (i32, i32) {
    %c0_i32 = arith.constant 0 : i32
    return %arg0, %arg1 : i32, i32
  }
  func.func @transform_5(%arg0: i32, %arg1: i32) -> (i32, i32) {
    %c0_i32 = arith.constant 0 : i32
    return %arg0, %arg1 : i32, i32
  }
  func.func @transform_6(%arg0: i32, %arg1: i32) -> (i32, i32) {
    %c0_i32 = arith.constant 0 : i32
    return %arg0, %arg1 : i32, i32
  }
  func.func @transform_7(%arg0: i32, %arg1: i32) -> (i32, i32) {
    %c0_i32 = arith.constant 0 : i32
    return %arg0, %arg1 : i32, i32
  }
}

module attributes {stable_mosaic.version = 11 : i64} {
  func.func @x_prep_kernel(%arg0: i32, %arg1: memref<8x16xf32, #tpu.memory_space<vmem>>, %arg2: memref<8x16xbf16, #tpu.memory_space<vmem>>, %arg3: memref<8x16xbf16, #tpu.memory_space<vmem>>) attributes {dimension_semantics = [#tpu.dimension_semantics<parallel>], iteration_bounds = array<i64: 1>, scalar_prefetch = 0 : i64, scratch_operands = 0 : i64, tpu.core_type = #tpu.core_type<tc>, window_params = [{transform_indices = @transform_0, window_bounds = array<i64: 8, 16>}, {transform_indices = @transform_1, window_bounds = array<i64: 8, 16>}, {transform_indices = @transform_2, window_bounds = array<i64: 8, 16>}]} {
    %c0 = arith.constant 0 : index
    %c0_0 = arith.constant 0 : index
    %0 = vector.load %arg1[%c0, %c0_0] : memref<8x16xf32, #tpu.memory_space<vmem>>, vector<8x16xf32>
    %cst = arith.constant 0.000000e+00 : f32
    %1 = vector.broadcast %cst : f32 to vector<8x16xf32>
    %2 = arith.maximumf %0, %1 : vector<8x16xf32>
    %3 = vector.broadcast %cst : f32 to vector<8x16xf32>
    %4 = arith.subf %0, %3 : vector<8x16xf32>
    %5 = arith.cmpf one, %4, %4 : vector<8x16xf32>
    %6 = vector.broadcast %cst : f32 to vector<8x16xf32>
    %7 = arith.addf %0, %6 : vector<8x16xf32>
    %8 = math.absf %4 : vector<8x16xf32>
    %cst_1 = arith.constant 0.000000e+00 : f32
    %9 = vector.broadcast %cst_1 : f32 to vector<8x16xf32>
    %10 = arith.subf %9, %8 : vector<8x16xf32>
    %11 = math.exp %10 : vector<8x16xf32>
    %12 = math.log1p %11 : vector<8x16xf32>
    %13 = arith.addf %2, %12 : vector<8x16xf32>
    %14 = arith.select %5, %7, %13 : vector<8x16xi1>, vector<8x16xf32>
    %15 = arith.truncf %14 : vector<8x16xf32> to vector<8x16xbf16>
    %c0_2 = arith.constant 0 : index
    %c0_3 = arith.constant 0 : index
    %16 = vector.load %arg2[%c0_2, %c0_3] : memref<8x16xbf16, #tpu.memory_space<vmem>>, vector<8x16xbf16>
    tpu.vector_store %arg2[%c0_2, %c0_3], %15 {strides = array<i32>} : memref<8x16xbf16, #tpu.memory_space<vmem>>, vector<8x16xbf16>,
    %17 = arith.truncf %0 : vector<8x16xf32> to vector<8x16xbf16>
    %c0_4 = arith.constant 0 : index
    %c0_5 = arith.constant 0 : index
    %18 = vector.load %arg3[%c0_4, %c0_5] : memref<8x16xbf16, #tpu.memory_space<vmem>>, vector<8x16xbf16>
    tpu.vector_store %arg3[%c0_4, %c0_5], %17 {strides = array<i32>} : memref<8x16xbf16, #tpu.memory_space<vmem>>, vector<8x16xbf16>,
    return
  }
  func.func @transform_0(%arg0: i32) -> (i32, i32) {
    %c0_i32 = arith.constant 0 : i32
    %c0_i32_0 = arith.constant 0 : i32
    return %arg0, %c0_i32 : i32, i32
  }
  func.func @transform_1(%arg0: i32) -> (i32, i32) {
    %c0_i32 = arith.constant 0 : i32
    %c0_i32_0 = arith.constant 0 : i32
    return %arg0, %c0_i32 : i32, i32
  }
  func.func @transform_2(%arg0: i32) -> (i32, i32) {
    %c0_i32 = arith.constant 0 : i32
    %c0_i32_0 = arith.constant 0 : i32
    return %arg0, %c0_i32 : i32, i32
  }
}

module attributes {stable_mosaic.version = 11 : i64} {
  func.func @gemm_kernel_zinb(%arg0: i32, %arg1: i32, %arg2: memref<8x16xbf16, #tpu.memory_space<vmem>>, %arg3: memref<8x16xbf16, #tpu.memory_space<vmem>>, %arg4: memref<16x32xbf16, #tpu.memory_space<vmem>>, %arg5: memref<16x32xbf16, #tpu.memory_space<vmem>>, %arg6: memref<1x32xf32, #tpu.memory_space<vmem>>, %arg7: memref<8x32xf32, #tpu.memory_space<vmem>>, %arg8: memref<8x32xf32, #tpu.memory_space<vmem>>) attributes {dimension_semantics = [#tpu.dimension_semantics<parallel>, #tpu.dimension_semantics<arbitrary>], iteration_bounds = array<i64: 1, 1>, scalar_prefetch = 0 : i64, scratch_operands = 0 : i64, tpu.core_type = #tpu.core_type<tc>, window_params = [{transform_indices = @transform_0, window_bounds = array<i64: 8, 16>}, {transform_indices = @transform_1, window_bounds = array<i64: 8, 16>}, {transform_indices = @transform_2, window_bounds = array<i64: 16, 32>}, {transform_indices = @transform_3, window_bounds = array<i64: 16, 32>}, {transform_indices = @transform_4, window_bounds = array<i64: 1, 32>}, {transform_indices = @transform_5, window_bounds = array<i64: 8, 32>}, {transform_indices = @transform_6, window_bounds = array<i64: 8, 32>}]} {
    %c0 = arith.constant 0 : index
    %c0_0 = arith.constant 0 : index
    %0 = vector.load %arg2[%c0, %c0_0] : memref<8x16xbf16, #tpu.memory_space<vmem>>, vector<8x16xbf16>
    %c0_1 = arith.constant 0 : index
    %c0_2 = arith.constant 0 : index
    %1 = vector.load %arg4[%c0_1, %c0_2] : memref<16x32xbf16, #tpu.memory_space<vmem>>, vector<16x32xbf16>
    %cst = arith.constant dense<0.000000e+00> : vector<8x32xf32>
    %2 = tpu.matmul %0, %1, %cst {dimension_numbers = #tpu.dot_dimension_numbers<[1], [0], [0], [1], [0, 0, 1, 1], [], []>} : vector<8x16xbf16>, vector<16x32xbf16>, vector<8x32xf32> -> vector<8x32xf32>
    %c0_3 = arith.constant 0 : index
    %c0_4 = arith.constant 0 : index
    %3 = vector.load %arg7[%c0_3, %c0_4] : memref<8x32xf32, #tpu.memory_space<vmem>>, vector<8x32xf32>
    tpu.vector_store %arg7[%c0_3, %c0_4], %2 {strides = array<i32>} : memref<8x32xf32, #tpu.memory_space<vmem>>, vector<8x32xf32>,
    %c0_5 = arith.constant 0 : index
    %c0_6 = arith.constant 0 : index
    %4 = vector.load %arg3[%c0_5, %c0_6] : memref<8x16xbf16, #tpu.memory_space<vmem>>, vector<8x16xbf16>
    %c0_7 = arith.constant 0 : index
    %c0_8 = arith.constant 0 : index
    %5 = vector.load %arg5[%c0_7, %c0_8] : memref<16x32xbf16, #tpu.memory_space<vmem>>, vector<16x32xbf16>
    %cst_9 = arith.constant dense<0.000000e+00> : vector<8x32xf32>
    %6 = tpu.matmul %4, %5, %cst_9 {dimension_numbers = #tpu.dot_dimension_numbers<[1], [0], [0], [1], [0, 0, 1, 1], [], []>} : vector<8x16xbf16>, vector<16x32xbf16>, vector<8x32xf32> -> vector<8x32xf32>
    %c0_10 = arith.constant 0 : index
    %c0_11 = arith.constant 0 : index
    %7 = vector.load %arg6[%c0_10, %c0_11] : memref<1x32xf32, #tpu.memory_space<vmem>>, vector<1x32xf32>
    %8 = vector.broadcast %7 : vector<1x32xf32> to vector<8x32xf32>
    %9 = arith.addf %6, %8 : vector<8x32xf32>
    %c0_12 = arith.constant 0 : index
    %c0_13 = arith.constant 0 : index
    %10 = vector.load %arg8[%c0_12, %c0_13] : memref<8x32xf32, #tpu.memory_space<vmem>>, vector<8x32xf32>
    tpu.vector_store %arg8[%c0_12, %c0_13], %9 {strides = array<i32>} : memref<8x32xf32, #tpu.memory_space<vmem>>, vector<8x32xf32>,
    return
  }
  func.func @transform_0(%arg0: i32, %arg1: i32) -> (i32, i32) {
    %c0_i32 = arith.constant 0 : i32
    %c0_i32_0 = arith.constant 0 : i32
    return %arg1, %c0_i32 : i32, i32
  }
  func.func @transform_1(%arg0: i32, %arg1: i32) -> (i32, i32) {
    %c0_i32 = arith.constant 0 : i32
    %c0_i32_0 = arith.constant 0 : i32
    return %arg1, %c0_i32 : i32, i32
  }
  func.func @transform_2(%arg0: i32, %arg1: i32) -> (i32, i32) {
    %c0_i32 = arith.constant 0 : i32
    %c0_i32_0 = arith.constant 0 : i32
    return %c0_i32, %arg0 : i32, i32
  }
  func.func @transform_3(%arg0: i32, %arg1: i32) -> (i32, i32) {
    %c0_i32 = arith.constant 0 : i32
    %c0_i32_0 = arith.constant 0 : i32
    return %c0_i32, %arg0 : i32, i32
  }
  func.func @transform_4(%arg0: i32, %arg1: i32) -> (i32, i32) {
    %c0_i32 = arith.constant 0 : i32
    %c0_i32_0 = arith.constant 0 : i32
    return %c0_i32, %arg0 : i32, i32
  }
  func.func @transform_5(%arg0: i32, %arg1: i32) -> (i32, i32) {
    %c0_i32 = arith.constant 0 : i32
    return %arg1, %arg0 : i32, i32
  }
  func.func @transform_6(%arg0: i32, %arg1: i32) -> (i32, i32) {
    %c0_i32 = arith.constant 0 : i32
    return %arg1, %arg0 : i32, i32
  }
}

</mosaic_0001>

<bundles_post_ra>
// kernel: decoder_forward.4
= control target key start
LH: loop header
LB: loop body
LE: loop exit
PB: predicated region body
PF: predicated region fallthrough
CT: control target
= control target key end

     0   :  { %vm30_vm0 = vcmask 125952   ;;  %s72_s0 = inlined_call_operand.vmem [shape: f32[8,16], index: 0, kind: input, shape index: {}]   ;;  %s73_s2 = inlined_call_operand.vmem [shape: bf16[8,16], index: 2, kind: output, shape index: {1}]   ;;  %s74_s1 = inlined_call_operand.vmem [shape: bf16[8,16], index: 1, kind: output, shape index: {0}]  }
   0x1   :  { %v10_v0 = vld [vmem:[%s72_s0] sm:$0xff] }
   0x2   :  { %v14_v1 = vand.u32 2147483647, %v10_v0  ;;  %v32_v2 = vpack.c.bf16 %v10_v0, %v10_v0  ;;  %v11_v12 = vmax.f32 %v10_v0, 0.0  ;;  %vm12_vm2 = vcmp.ne.f32.partialorder %v10_v0, %v10_v0 }
   0x4   :  { %v15_v3 = vsub.f32 0.0, %v14_v1  ;;  %33 = vst.msk [vmem:[%s73_s2] sm:$0xf] %vm30_vm0, %v32_v2 }
   0x6   :  { %v16_v4 = vmul.f32 1.442695, %v15_v3 }
   0x8   :  { %42 = vpow2.f32 %v16_v4 }
  0x12   :  { %v43_v5 = vpop.eup %42 }
  0x13   :  { %v18_v6 = vadd.f32 1.0, %v43_v5  ;;  %v21_v7 = vmul.f32 -0.5, %v43_v5  ;;  %v24_v9 = vand.u32 2147483647, %v43_v5 }
  0x15   :  { %44 = vlog2.f32 %v18_v6  ;;  %v22_v8 = vadd.f32 1.0, %v21_v7  ;;  %vm25_vm1 = vcmp.lt.f32.partialorder %v24_v9, 0.0004427343 }
  0x17   :  { %v23_v10 = vmul.f32 %v43_v5, %v22_v8 }
  0x1f   :  { %v45_v11 = vpop.eup %44 }
  0x20   :  { %v20_v13 = vmul.f32 0.6931472, %v45_v11 }
  0x22   :  { %v26_v14 = vsel %vm25_vm1, %v23_v10, %v20_v13 }
  0x23   :  { %v27_v15 = vadd.f32 %v26_v14, %v11_v12 }
  0x25   :  { %v28_v16 = vsel %vm12_vm2, %v10_v0, %v27_v15 }
  0x26   :  { %v29_v17 = vpack.c.bf16 %v28_v16, %v28_v16 }
  0x28   :  { %31 = vst.msk [vmem:[%s74_s1] sm:$0xf] %vm30_vm0, %v29_v17 }

// kernel: decoder_forward.3
= control target key start
LH: loop header
LB: loop body
LE: loop exit
PB: predicated region body
PF: predicated region fallthrough
CT: control target
= control target key end

     0   :  { %13 = vsyncpa [#allocation3], 0  ;;  %s501_s0 = inlined_call_operand.vmem [shape: f32[16,32], index: 0, kind: input, shape index: {}]   ;;  %s502_s1 = inlined_call_operand.vmem [shape: f32[16,32], index: 1, kind: input, shape index: {}]   ;;  %s503_s2 = inlined_call_operand.hbm [shape: f32[16,32], index: 2, kind: input, shape index: {}]   ;;  %s504_s3 = inlined_call_operand.hbm [shape: f32[16,32], index: 3, kind: input, shape index: {}]   ;;  %s505_s4 = inlined_call_operand.hbm [shape: f32[16,32], index: 4, kind: input, shape index: {}]   ;;  %s506_s5 = inlined_call_operand.hbm [shape: f32[16,32], index: 5, kind: input, shape index: {}]   ;;  %s507_s6 = inlined_call_operand.hbm [shape: f32[16,32], index: 6, kind: output, shape index: {0}]   ;;  %s508_s7 = inlined_call_operand.vmem [shape: bf16[16,32], index: 7, kind: output, shape index: {1}]  }
   0x1   :  { %14 = vsyncpa [#allocation6], 0 }
   0x2   :  { %15 = vsyncpa [#allocation9], 0 }
   0x3   :  { %16 = vsyncpa [#allocation4], 0  ;;  %s347_s24 = smov [#allocation5]   ;;  %s348_s26 = smov [#allocation2]  }
   0x4   :  { %s38_s25 = sshll.u32 %s347_s24, 4  ;;  %s26_s27 = sshll.u32 %s348_s26, 4  ;;  %s39_s25 = int_to_ptr.vmem [resolvable:$true] %s38_s25  ;;  %s394_s27 = int_to_ptr.vmem [resolvable:$true] %s26_s27 }
   0x5   :  { %s229_s30 = scalar_lea.hbm %s504_s3, 256 }
   0x6   :  { %p230_p0 = scmp.ne.s32.totalorder %s504_s3, %s229_s30  ;;  %p233_p1 = scmp.lt.u32.totalorder %s229_s30, %s504_s3 }
   0x8   :  { %p235_p2 = pnand %p233_p1, %p230_p0 }
   0xa   :  { %238 = shalt.err (!%p235_p2)
}
   0xb   :  { %s239_s12 = scalar_lea.vmem %s39_s25, 256  ;;  %p244_p4 = scmp.lt.s32.totalorder %s39_s25, %s39_s25 }
   0xc   :  { %p240_p3 = scmp.ne.s32.totalorder %s39_s25, %s239_s12  ;;  %p245_p5 = scmp.lt.s32.totalorder %s239_s12, %s239_s12 }
   0xe   :  { %p246_p6 = por %p245_p5, %p244_p4 }
  0x10   :  { %p247_p7 = pnand %p246_p6, %p240_p3 }
  0x12   :  { %250 = shalt.err (!%p247_p7)
}
  0x13   :  { %s349_s13 = smov 128   ;;  %s350_s14 = smov 8  }
  0x14   :  { %44 = dma.hbm_to_vmem [thread:$0]  %s504_s3, 256, %s39_s25, [#allocation6], %s349_s13, %s349_s13, %s350_s14  }
  0x15   :  { %s251_s19 = scalar_lea.hbm %s503_s2, 256 }
  0x16   :  { %p252_p8 = scmp.ne.s32.totalorder %s503_s2, %s251_s19  ;;  %p255_p9 = scmp.lt.u32.totalorder %s251_s19, %s503_s2 }
  0x18   :  { %p257_p10 = pnand %p255_p9, %p252_p8 }
  0x1a   :  { %260 = shalt.err (!%p257_p10)
}
  0x1b   :  { %s261_s24 = scalar_lea.vmem %s394_s27, 256  ;;  %p266_p12 = scmp.lt.s32.totalorder %s394_s27, %s394_s27 }
  0x1c   :  { %p262_p11 = scmp.ne.s32.totalorder %s394_s27, %s261_s24  ;;  %p267_p13 = scmp.lt.s32.totalorder %s261_s24, %s261_s24 }
  0x1e   :  { %p268_p0 = por %p267_p13, %p266_p12 }
  0x20   :  { %p269_p1 = pnand %p268_p0, %p262_p11 }
  0x22   :  { %272 = shalt.err (!%p269_p1)
}
  0x23   :  { %32 = dma.hbm_to_vmem [thread:$0]  %s503_s2, 256, %s394_s27, [#allocation3], %s349_s13, %s349_s13, %s350_s14  }
  0x24   :  { %s351_s26 = smov [#allocation7]   ;;  %s352_s29 = smov [#allocation8]  }
  0x25   :  { %s50_s28 = sshll.u32 %s351_s26, 4  ;;  %s62_s30 = sshll.u32 %s352_s29, 4  ;;  %s51_s28 = int_to_ptr.vmem [resolvable:$true] %s50_s28  ;;  %s431_s30 = int_to_ptr.vmem [resolvable:$true] %s62_s30 }
  0x26   :  { %s273_s10 = scalar_lea.hbm %s505_s4, 256 }
  0x27   :  { %p274_p2 = scmp.ne.s32.totalorder %s505_s4, %s273_s10  ;;  %p277_p3 = scmp.lt.u32.totalorder %s273_s10, %s505_s4 }
  0x29   :  { %p279_p4 = pnand %p277_p3, %p274_p2 }
  0x2b   :  { %282 = shalt.err (!%p279_p4)
}
  0x2c   :  { %s283_s2 = scalar_lea.vmem %s51_s28, 256  ;;  %p288_p6 = scmp.lt.s32.totalorder %s51_s28, %s51_s28 }
  0x2d   :  { %p284_p5 = scmp.ne.s32.totalorder %s51_s28, %s283_s2  ;;  %p289_p7 = scmp.lt.s32.totalorder %s283_s2, %s283_s2 }
  0x2f   :  { %p290_p8 = por %p289_p7, %p288_p6 }
  0x31   :  { %p291_p9 = pnand %p290_p8, %p284_p5 }
  0x33   :  { %294 = shalt.err (!%p291_p9)
}
  0x34   :  { %56 = dma.hbm_to_vmem [thread:$0]  %s505_s4, 256, %s51_s28, [#allocation6], %s349_s13, %s349_s13, %s350_s14  }
  0x35   :  { %s295_s20 = scalar_lea.hbm %s506_s5, 256 }
  0x36   :  { %p296_p10 = scmp.ne.s32.totalorder %s506_s5, %s295_s20  ;;  %p299_p11 = scmp.lt.u32.totalorder %s295_s20, %s506_s5 }
  0x38   :  { %p301_p12 = pnand %p299_p11, %p296_p10 }
  0x3a   :  { %304 = shalt.err (!%p301_p12)
}
  0x3b   :  { %s305_s3 = scalar_lea.vmem %s431_s30, 256  ;;  %p310_p0 = scmp.lt.s32.totalorder %s431_s30, %s431_s30 }
  0x3c   :  { %p306_p13 = scmp.ne.s32.totalorder %s431_s30, %s305_s3  ;;  %p311_p1 = scmp.lt.s32.totalorder %s305_s3, %s305_s3 }
  0x3e   :  { %p312_p2 = por %p311_p1, %p310_p0 }
  0x40   :  { %p313_p3 = pnand %p312_p2, %p306_p13 }
  0x42   :  { %316 = shalt.err (!%p313_p3)
}
  0x43   :  { %68 = dma.hbm_to_vmem [thread:$0]  %s506_s5, 256, %s431_s30, [#allocation9], %s349_s13, %s349_s13, %s350_s14  }
  0x44   :  { %339 = dma.done.wait [#allocation3], 256  }
  0x45   :  { %340 = vsyncadd [#allocation3], 4294967040 }
  0x46   :  { %341 = dma.done.wait [#allocation6], 512  }
  0x47   :  { %342 = vsyncadd [#allocation6], 4294966784 }
  0x48   :  { %343 = dma.done.wait [#allocation9], 256  }
  0x49   :  { %344 = vsyncadd [#allocation9], 4294967040  ;;  %v83_v0 = vld [vmem:[%s502_s1] sm:$0xff]  ;;  %v84_v2 = vld [vmem:[%s502_s1 + $0x8] sm:$0xff]  ;;  %vm101_vm0 = vcmask 261120  }
  0x4a   :  { %v87_v1 = vmul.f32 0.5, %v83_v0  ;;  %v88_v3 = vmul.f32 0.5, %v84_v2  ;;  %v106_v4 = vld [vmem:[#allocation7] sm:$0xff]  ;;  %v107_v7 = vld [vmem:[#allocation7 + $0x8] sm:$0xff]  ;;  %v108_v16 = vld [vmem:[#allocation8] sm:$0xff] }
  0x4b   :  { %v110_v6 = vmul.f32 0.5, %v106_v4  ;;  %v111_v9 = vmul.f32 0.5, %v107_v7  ;;  %v85_v12 = vld [vmem:[#allocation2] sm:$0xff]  ;;  %v86_v13 = vld [vmem:[#allocation2 + $0x8] sm:$0xff]  ;;  %v109_v20 = vld [vmem:[#allocation8 + $0x8] sm:$0xff] }
  0x4c   :  { %v89_v5 = vmul.f32 1.442695, %v87_v1  ;;  %v91_v8 = vmul.f32 1.442695, %v88_v3  ;;  %v81_v15 = vld [vmem:[%s501_s0] sm:$0xff]  ;;  %v82_v19 = vld [vmem:[%s501_s0 + $0x8] sm:$0xff] }
  0x4d   :  { %v112_v10 = vmul.f32 1.442695, %v110_v6  ;;  %v114_v11 = vmul.f32 1.442695, %v111_v9  ;;  %v104_v23 = vld [vmem:[#allocation5] sm:$0xff]  ;;  %v105_v27 = vld [vmem:[#allocation5 + $0x8] sm:$0xff] }
  0x4e   :  { %205 = vpow2.f32 %v89_v5  ;;  %s353_s0 = smov [#allocation10]  }
  0x4f   :  { %207 = vpow2.f32 %v91_v8  ;;  %s176_s10 = sshll.u32 %s353_s0, 4  ;;  %s177_s10 = int_to_ptr.vmem [resolvable:$true] %s176_s10 }
  0x50   :  { %209 = vpow2.f32 %v112_v10  ;;  %s317_s11 = scalar_lea.vmem %s177_s10, 256  ;;  %p322_p5 = scmp.lt.s32.totalorder %s177_s10, %s177_s10 }
  0x51   :  { %211 = vpow2.f32 %v114_v11  ;;  %p318_p4 = scmp.ne.s32.totalorder %s177_s10, %s317_s11  ;;  %p323_p6 = scmp.lt.s32.totalorder %s317_s11, %s317_s11 }
  0x53   :  { %p324_p7 = por %p323_p6, %p322_p5 }
  0x55   :  { %p325_p8 = pnand %p324_p7, %p318_p4 }
  0x58   :  { %v206_v14 = vpop.eup %205 }
  0x59   :  { %v208_v17 = vpop.eup %207  ;;  %v93_v18 = vmul.f32 %v206_v14, %v85_v12 }
  0x5a   :  { %v210_v21 = vpop.eup %209  ;;  %v94_v22 = vmul.f32 %v208_v17, %v86_v13 }
  0x5b   :  { %v212_v24 = vpop.eup %211  ;;  %v95_v25 = vadd.f32 %v93_v18, %v81_v15  ;;  %v116_v26 = vmul.f32 %v210_v21, %v108_v16 }
  0x5c   :  { %v96_v28 = vadd.f32 %v94_v22, %v82_v19  ;;  %v117_v29 = vmul.f32 %v212_v24, %v109_v20 }
  0x5d   :  { %v97_v30 = vmul.f32 1.442695, %v95_v25  ;;  %v118_v31 = vadd.f32 %v116_v26, %v104_v23 }
  0x5e   :  { %v99_v32 = vmul.f32 1.442695, %v96_v28  ;;  %v119_v33 = vadd.f32 %v117_v29, %v105_v27 }
  0x5f   :  { %213 = vpow2.f32 %v97_v30  ;;  %v120_v34 = vmul.f32 1.442695, %v118_v31 }
  0x60   :  { %215 = vpow2.f32 %v99_v32  ;;  %v122_v35 = vmul.f32 1.442695, %v119_v33 }
  0x61   :  { %217 = vpow2.f32 %v120_v34 }
  0x62   :  { %219 = vpow2.f32 %v122_v35 }
  0x69   :  { %v214_v36 = vpop.eup %213 }
  0x6a   :  { %v216_v37 = vpop.eup %215  ;;  %102 = vst.msk [vmem:[#allocation10] sm:$0xff] %vm101_vm0, %v214_v36 }
  0x6b   :  { %v218_v38 = vpop.eup %217  ;;  %103 = vst.msk [vmem:[#allocation10 + $0x8] sm:$0xff] %vm101_vm0, %v216_v37 }
  0x6c   :  { %v220_v39 = vpop.eup %219  ;;  %v130_v40 = vand.u32 2147483647, %v218_v38 }
  0x6d   :  { %328 = shalt.err (!%p325_p8)
}
  0x6e   :  { %s329_s16 = scalar_lea.hbm %s507_s6, 256 }
  0x6f   :  { %p330_p9 = scmp.ne.s32.totalorder %s507_s6, %s329_s16  ;;  %p333_p10 = scmp.lt.u32.totalorder %s329_s16, %s507_s6 }
  0x71   :  { %p335_p11 = pnand %p333_p10, %p330_p9 }
  0x73   :  { %338 = shalt.err (!%p335_p11)
}
  0x74   :  { %182 = dma.vmem_to_hbm [thread:$0]  %s177_s10, 256, %s507_s6, [#allocation4], %s349_s13, %s349_s13, %s350_s14   ;;  %v131_v41 = vand.u32 2147483647, %v220_v39  ;;  %v132_v42 = vsub.f32 0.0, %v130_v40  ;;  %v124_v58 = vmax.f32 %v218_v38, 0.0  ;;  %vm126_vm3 = vcmp.ne.f32.partialorder %v218_v38, %v218_v38 }
  0x75   :  { %v125_v62 = vmax.f32 %v220_v39, 0.0  ;;  %vm127_vm4 = vcmp.ne.f32.partialorder %v220_v39, %v220_v39  ;;  %vm168_vm5 = vcmask 257024  }
  0x76   :  { %v133_v43 = vsub.f32 0.0, %v131_v41  ;;  %v134_v44 = vmul.f32 1.442695, %v132_v42 }
  0x78   :  { %v136_v45 = vmul.f32 1.442695, %v133_v43  ;;  %221 = vpow2.f32 %v134_v44 }
  0x7a   :  { %223 = vpow2.f32 %v136_v45 }
  0x82   :  { %v222_v46 = vpop.eup %221 }
  0x83   :  { %v138_v48 = vadd.f32 1.0, %v222_v46  ;;  %v141_v50 = vmul.f32 -0.5, %v222_v46  ;;  %v144_v53 = vand.u32 2147483647, %v222_v46 }
  0x84   :  { %v224_v47 = vpop.eup %223 }
  0x85   :  { %v147_v49 = vadd.f32 1.0, %v224_v47  ;;  %225 = vlog2.f32 %v138_v48  ;;  %v150_v51 = vmul.f32 -0.5, %v224_v47  ;;  %v142_v52 = vadd.f32 1.0, %v141_v50 }
  0x86   :  { %v153_v55 = vand.u32 2147483647, %v224_v47  ;;  %vm145_vm1 = vcmp.lt.f32.partialorder %v144_v53, 0.0004427343 }
  0x87   :  { %227 = vlog2.f32 %v147_v49  ;;  %v151_v54 = vadd.f32 1.0, %v150_v51  ;;  %v143_v56 = vmul.f32 %v222_v46, %v142_v52 }
  0x88   :  { %vm154_vm2 = vcmp.lt.f32.partialorder %v153_v55, 0.0004427343 }
  0x89   :  { %v152_v59 = vmul.f32 %v224_v47, %v151_v54 }
  0x8f   :  { %v226_v57 = vpop.eup %225 }
  0x90   :  { %v140_v61 = vmul.f32 0.6931472, %v226_v57 }
  0x91   :  { %v228_v60 = vpop.eup %227 }
  0x92   :  { %v149_v63 = vmul.f32 0.6931472, %v228_v60  ;;  %v146_v0 = vsel %vm145_vm1, %v143_v56, %v140_v61 }
  0x93   :  { %v156_v1 = vadd.f32 %v146_v0, %v124_v58 }
  0x94   :  { %v155_v2 = vsel %vm154_vm2, %v152_v59, %v149_v63 }
  0x95   :  { %v157_v3 = vadd.f32 %v155_v2, %v125_v62  ;;  %v158_v4 = vsel %vm126_vm3, %v218_v38, %v156_v1 }
  0x96   :  { %v196_v5 = vpack.c.bf16 %v158_v4, %v158_v4 }
  0x97   :  { %v159_v6 = vsel %vm127_vm4, %v220_v39, %v157_v3 }
  0x98   :  { %v197_v7 = vpack.c.bf16 %v159_v6, %v159_v6  ;;  %169 = vst.msk [vmem:[%s508_s7] sm:$0xf] %vm168_vm5, %v196_v5 }
  0x9a   :  { %170 = vst.msk [vmem:[%s508_s7 + $0x4] sm:$0xf] %vm168_vm5, %v197_v7 }
  0x9b   :  { %345 = dma.done.wait [#allocation4], 256  }
  0x9c   :  { %346 = vsyncadd [#allocation4], 4294967040 }
  0x9d   :  { %190 = vsyncpa [#allocation3], 1 }
  0x9e   :  { %191 = vsyncpa [#allocation6], 1 }
  0x9f   :  { %192 = vsyncpa [#allocation9], 1 }
  0xa0   :  { %193 = vsyncpa [#allocation4], 1 }

// kernel: decoder_forward.5
= control target key start
LH: loop header
LB: loop body
LE: loop exit
PB: predicated region body
PF: predicated region fallthrough
CT: control target
= control target key end

     0   :  { %12 = vsyncpa [#allocation3], 0  ;;  %v243_v1 = vmov 0.0   ;;  %vm244_vm0 = vmmov 0   ;;  %vm34_vm1 = vcmask 130048   ;;  %s330_s0 = inlined_call_operand.vmem [shape: bf16[8,16], index: 0, kind: input, shape index: {}]   ;;  %s331_s1 = inlined_call_operand.vmem [shape: bf16[8,16], index: 1, kind: input, shape index: {}]   ;;  %s332_s2 = inlined_call_operand.vmem [shape: bf16[16,32], index: 2, kind: input, shape index: {}]   ;;  %s333_s3 = inlined_call_operand.vmem [shape: bf16[16,32], index: 3, kind: input, shape index: {}]   ;;  %s334_s4 = inlined_call_operand.vmem [shape: f32[1,32], index: 4, kind: input, shape index: {}]   ;;  %s335_s5 = inlined_call_operand.hbm [shape: f32[8,32], index: 5, kind: output, shape index: {0}]   ;;  %s336_s6 = inlined_call_operand.hbm [shape: f32[8,32], index: 6, kind: output, shape index: {1}]  }
   0x1   :  { %v193_v0 = vld [vmem:[%s332_s2] sm:$0xff]   ;;  %177 = vmatprep.subr.bf16.mxu0 %v243_v1  ;;  %183 = vmatprep.subr.bf16.mxu1 %v243_v1 }
   0x2   :  { %v194_v2 = vld [vmem:[%s333_s3] sm:$0xff]   ;;  %178 = vmatpush3.bf16.msra.mxu0 %v193_v0  ;;  %179 = vmatprep.mubr.msk.bf16.mxu0 %vm244_vm0, %v243_v1 }
   0x3   :  { %v25_v3 = vld [vmem:[%s330_s0] sm:$0xf]  ;;  %184 = vmatpush3.bf16.msra.mxu1 %v194_v2  ;;  %185 = vmatprep.mubr.msk.bf16.mxu1 %vm244_vm0, %v243_v1 }
   0x4   :  { %v80_v4 = vld [vmem:[%s331_s1] sm:$0xf] }
   0x5   :  { %13 = vsyncpa [#allocation5], 0  ;;  %180 = vmatmul.mubr.msk.bf16.vlgmr.msra.gmra.mrb[0].mxu0 %vm34_vm1, %v25_v3  ;;  %s245_s2 = smov [#allocation2]   ;;  %vm78_vm2 = vcmask 261120   ;;  %s246_s3 = smov [#allocation4]  }
   0x6   :  { %186 = vmatmul.mubr.msk.bf16.vlgmr.msra.gmra.mrb[0].mxu1 %vm34_vm1, %v80_v4  ;;  %s146_s29 = sshll.u32 %s245_s2, 4  ;;  %s156_s30 = sshll.u32 %s246_s3, 4  ;;  %v170_v5 = vld [vmem:[%s334_s4] ss:$0 sm:$0xff]  ;;  %s147_s29 = int_to_ptr.vmem [resolvable:$true] %s146_s29  ;;  %s298_s30 = int_to_ptr.vmem [resolvable:$true] %s156_s30 }
   0x7   :  { %s195_s0 = scalar_lea.vmem %s147_s29, 128  ;;  %p200_p1 = scmp.lt.s32.totalorder %s147_s29, %s147_s29 }
   0x8   :  { %p196_p0 = scmp.ne.s32.totalorder %s147_s29, %s195_s0  ;;  %p201_p2 = scmp.lt.s32.totalorder %s195_s0, %s195_s0 }
   0xa   :  { %p202_p3 = por %p201_p2, %p200_p1 }
   0xc   :  { %p203_p4 = pnand %p202_p3, %p196_p0 }
  0xd8   :  { %v72_v6 = vpop.f32.mrb[0].mxu0 }
  0xd9   :  { %v133_v7 = vpop.f32.mrb[0].mxu1  ;;  %v181_v8 = vpop.f32.mrb[1].mxu0  ;;  %79 = vst.msk [vmem:[#allocation2] sm:$0xff] %vm78_vm2, %v72_v6 }
  0xda   :  { %v134_v9 = vadd.f32 %v170_v5, %v133_v7  ;;  %v187_v10 = vpop.f32.mrb[1].mxu1  ;;  %v75_v11 = vpop.f32.mrb[2].mxu0 }
  0xdb   :  { %206 = shalt.err (!%p203_p4)
}
  0xdc   :  { %s207_s9 = scalar_lea.hbm %s335_s5, 128 }
  0xdd   :  { %p208_p5 = scmp.ne.s32.totalorder %s335_s5, %s207_s9  ;;  %p211_p6 = scmp.lt.u32.totalorder %s207_s9, %s335_s5 }
  0xdf   :  { %p213_p7 = pnand %p211_p6, %p208_p5 }
  0xe1   :  { %216 = shalt.err (!%p213_p7)
}
  0xe2   :  { %149 = dma.vmem_to_hbm [thread:$0]  %s147_s29, 128, %s335_s5, [#allocation3]   ;;  %v136_v12 = vpop.f32.mrb[2].mxu1  ;;  %v182_v13 = vpop.f32.mrb[3].mxu0  ;;  %139 = vst.msk [vmem:[#allocation4] sm:$0xff] %vm78_vm2, %v134_v9 }
  0xe3   :  { %v188_v14 = vpop.f32.mrb[3].mxu1  ;;  %s217_s16 = scalar_lea.vmem %s298_s30, 128  ;;  %p222_p9 = scmp.lt.s32.totalorder %s298_s30, %s298_s30 }
  0xe4   :  { %p218_p8 = scmp.ne.s32.totalorder %s298_s30, %s217_s16  ;;  %p223_p10 = scmp.lt.s32.totalorder %s217_s16, %s217_s16 }
  0xe6   :  { %p224_p11 = por %p223_p10, %p222_p9 }
  0xe8   :  { %p225_p12 = pnand %p224_p11, %p218_p8 }
  0xea   :  { %228 = shalt.err (!%p225_p12)
}
  0xeb   :  { %s229_s19 = scalar_lea.hbm %s336_s6, 128 }
  0xec   :  { %p230_p13 = scmp.ne.s32.totalorder %s336_s6, %s229_s19  ;;  %p233_p0 = scmp.lt.u32.totalorder %s229_s19, %s336_s6 }
  0xee   :  { %p235_p1 = pnand %p233_p0, %p230_p13 }
  0xf0   :  { %238 = shalt.err (!%p235_p1)
}
  0xf1   :  { %159 = dma.vmem_to_hbm [thread:$0]  %s298_s30, 128, %s336_s6, [#allocation5]  }
  0xf2   :  { %239 = dma.done.wait [#allocation3], 128  }
  0xf3   :  { %240 = vsyncadd [#allocation3], 4294967168 }
  0xf4   :  { %241 = dma.done.wait [#allocation5], 128  }
  0xf5   :  { %242 = vsyncadd [#allocation5], 4294967168 }
  0xf6   :  { %166 = vsyncpa [#allocation3], 1 }
  0xf7   :  { %167 = vsyncpa [#allocation5], 1 }

</bundles_post_ra>
